<compile_context>
chip_gen: v5e
topology: v5e:2x2
jax: 0.10.0
libtpu: 0.0.40
codegen_flags: <defaults>
</compile_context>

<pallas_src>
import functools

import jax
import jax.numpy as jnp
from jax.experimental import pallas as pl
from jax.experimental.pallas import tpu as pltpu


def _dnnnet_kernel(*refs, num_hidden: int):
    # refs layout:
    #   x_ref,
    #   w0, b0, w1, b1, ..., w_{nh-1}, b_{nh-1},   hidden Linear+ReLU layers
    #   w_out,                                     output projection (no bias)
    #   y_ref, last_h_ref                          outputs
    x_ref = refs[0]
    param_refs = refs[1:1 + 2 * num_hidden + 1]
    y_ref, last_h_ref = refs[1 + 2 * num_hidden + 1:]

    h = x_ref[...]                                           # (TM, D0) f32

    for i in range(num_hidden):                              # static unroll
        w = param_refs[2 * i][...]                           # (D_i, D_{i+1})
        b = param_refs[2 * i + 1][...]                       # (1, D_{i+1})
        h = jnp.dot(h, w, preferred_element_type=jnp.float32) + b
        h = jnp.maximum(h, jnp.float32(0.0))                 # ReLU (hidden & DeepFF out act)

    last_h_ref[...] = h.astype(last_h_ref.dtype)

    w_out = param_refs[2 * num_hidden][...]                  # (D_{n-1}, D_n)
    y = jnp.dot(h, w_out, preferred_element_type=jnp.float32)
    y_ref[...] = y.astype(y_ref.dtype)


def dnnnet_forward(x, params, *, row_tile: int = 8):
    """Runs DNNNet.forward. Returns (y, last_h)."""
    hidden_ws = params["hidden_w"]     # list of (D_i, D_{i+1})
    hidden_bs = params["hidden_b"]     # list of (1, D_{i+1})
    w_out = params["out_w"]            # (D_{n-1}, D_n)

    orig_shape = x.shape
    d_in = orig_shape[-1]
    x2 = x.reshape(-1, d_in).astype(jnp.float32)             # (B*L, D0)
    rows = x2.shape[0]

    padded_rows = pl.cdiv(rows, row_tile) * row_tile
    if padded_rows != rows:
        x2 = jnp.pad(x2, ((0, padded_rows - rows), (0, 0)))

    num_hidden = len(hidden_ws)
    d_last = hidden_ws[-1].shape[1] if num_hidden else d_in
    d_out = w_out.shape[1]

    grid = (padded_rows // row_tile,)

    row_map = lambda i: (i, 0)     # tiled over rows
    const_map = lambda i: (0, 0)   # weights: same block every step -> stay resident

    in_specs = [pl.BlockSpec((row_tile, d_in), row_map)]
    args = [x2]
    for w, b in zip(hidden_ws, hidden_bs):
        in_specs.append(pl.BlockSpec(w.shape, const_map))
        in_specs.append(pl.BlockSpec(b.shape, const_map))
        args += [w, b]
    in_specs.append(pl.BlockSpec(w_out.shape, const_map))
    args.append(w_out)

    out_specs = [
        pl.BlockSpec((row_tile, d_out), row_map),
        pl.BlockSpec((row_tile, d_last), row_map),
    ]
    out_shapes = (
        jax.ShapeDtypeStruct((padded_rows, d_out), jnp.float32),
        jax.ShapeDtypeStruct((padded_rows, d_last), jnp.float32),
    )

    kernel = functools.partial(_dnnnet_kernel, num_hidden=num_hidden)

    y2, h2 = pl.pallas_call(
        kernel,
        out_shape=out_shapes,
        grid_spec=pltpu.PrefetchScalarGridSpec(
            num_scalar_prefetch=0,
            grid=grid,
            in_specs=in_specs,
            out_specs=out_specs,
        ),
        compiler_params=pltpu.CompilerParams(
            dimension_semantics=("parallel",)),
    )(*args)

    y2 = y2[:rows]
    h2 = h2[:rows]

    if len(orig_shape) > 2:
        lead = orig_shape[:2]   # matches PyTorch's view(size(0), size(1), -1)
        y = y2.reshape(lead + (d_out,))
        last_h = h2.reshape(lead + (d_last,))
    else:
        y, last_h = y2, h2
    return y, last_h


def init_params(key, layer_size):
    """Deterministic parameter init.

    DeepFFNet uses layer_size[:-1] (Linear+ReLU per consecutive pair, bias=True);
    Outputer maps layer_size[-2] -> layer_size[-1] with bias=False, no activation.
    Weights are stored pre-transposed as (in, out) for x @ W layout.
    """
    deep_sizes = layer_size[:-1]
    num_hidden = len(deep_sizes) - 1
    keys = jax.random.split(key, 2 * num_hidden + 1)
    s = 0.02

    hidden_w, hidden_b = [], []
    for i in range(num_hidden):
        w = s * jax.random.normal(
            keys[2 * i], (deep_sizes[i], deep_sizes[i + 1]), jnp.float32)
        b = s * jax.random.normal(
            keys[2 * i + 1], (1, deep_sizes[i + 1]), jnp.float32)
        hidden_w.append(w)
        hidden_b.append(b)

    out_w = s * jax.random.normal(
        keys[-1], (layer_size[-2], layer_size[-1]), jnp.float32)

    return {"hidden_w": hidden_w, "hidden_b": hidden_b, "out_w": out_w}


if __name__ == "__main__":
    # DNNNet(layer_size=[32, 64, 48, 16], hidden_act_type='relu',
    #        out_act_type=None, batch_norm=False, dropout=0.0)
    B, L = 2, 8
    layer_size = [32, 64, 48, 16]

    key = jax.random.PRNGKey(0)
    kx, kp = jax.random.split(key)

    x = jax.random.normal(kx, (B, L, layer_size[0]), jnp.float32)
    params = init_params(kp, layer_size)

    y, last_h = dnnnet_forward(x, params)
    jax.block_until_ready((y, last_h))

    assert y.shape == (B, L, layer_size[-1])
    assert last_h.shape == (B, L, layer_size[-2])
    print("KERNEL_OK")
</pallas_src>

<mosaic_0001>
module attributes {stable_mosaic.version = 11 : i64} {
  func.func @_dnnnet_kernel(%arg0: i32, %arg1: memref<8x32xf32, #tpu.memory_space<vmem>>, %arg2: memref<32x64xf32, #tpu.memory_space<vmem>>, %arg3: memref<1x64xf32, #tpu.memory_space<vmem>>, %arg4: memref<64x48xf32, #tpu.memory_space<vmem>>, %arg5: memref<1x48xf32, #tpu.memory_space<vmem>>, %arg6: memref<48x16xf32, #tpu.memory_space<vmem>>, %arg7: memref<8x16xf32, #tpu.memory_space<vmem>>, %arg8: memref<8x48xf32, #tpu.memory_space<vmem>>) attributes {dimension_semantics = [#tpu.dimension_semantics<parallel>], iteration_bounds = array<i64: 2>, scalar_prefetch = 0 : i64, scratch_operands = 0 : i64, tpu.core_type = #tpu.core_type<tc>, window_params = [{transform_indices = @transform_0, window_bounds = array<i64: 8, 32>}, {pipeline_mode = #tpu.pipeline_mode<synchronous>, transform_indices = @transform_1, window_bounds = array<i64: 32, 64>}, {pipeline_mode = #tpu.pipeline_mode<synchronous>, transform_indices = @transform_2, window_bounds = array<i64: 1, 64>}, {pipeline_mode = #tpu.pipeline_mode<synchronous>, transform_indices = @transform_3, window_bounds = array<i64: 64, 48>}, {pipeline_mode = #tpu.pipeline_mode<synchronous>, transform_indices = @transform_4, window_bounds = array<i64: 1, 48>}, {pipeline_mode = #tpu.pipeline_mode<synchronous>, transform_indices = @transform_5, window_bounds = array<i64: 48, 16>}, {transform_indices = @transform_6, window_bounds = array<i64: 8, 16>}, {transform_indices = @transform_7, window_bounds = array<i64: 8, 48>}]} {
    %c0 = arith.constant 0 : index
    %c0_0 = arith.constant 0 : index
    %0 = vector.load %arg1[%c0, %c0_0] : memref<8x32xf32, #tpu.memory_space<vmem>>, vector<8x32xf32>
    %c0_1 = arith.constant 0 : index
    %c0_2 = arith.constant 0 : index
    %1 = vector.load %arg2[%c0_1, %c0_2] : memref<32x64xf32, #tpu.memory_space<vmem>>, vector<32x64xf32>
    %c0_3 = arith.constant 0 : index
    %c0_4 = arith.constant 0 : index
    %2 = vector.load %arg3[%c0_3, %c0_4] : memref<1x64xf32, #tpu.memory_space<vmem>>, vector<1x64xf32>
    %cst = arith.constant dense<0.000000e+00> : vector<8x64xf32>
    %3 = tpu.matmul %0, %1, %cst {dimension_numbers = #tpu.dot_dimension_numbers<[1], [0], [0], [1], [0, 0, 1, 1], [], []>} : vector<8x32xf32>, vector<32x64xf32>, vector<8x64xf32> -> vector<8x64xf32>
    %4 = vector.broadcast %2 : vector<1x64xf32> to vector<8x64xf32>
    %5 = arith.addf %3, %4 : vector<8x64xf32>
    %cst_5 = arith.constant 0.000000e+00 : f32
    %6 = vector.broadcast %cst_5 : f32 to vector<8x64xf32>
    %7 = arith.maximumf %5, %6 : vector<8x64xf32>
    %c0_6 = arith.constant 0 : index
    %c0_7 = arith.constant 0 : index
    %8 = vector.load %arg4[%c0_6, %c0_7] : memref<64x48xf32, #tpu.memory_space<vmem>>, vector<64x48xf32>
    %c0_8 = arith.constant 0 : index
    %c0_9 = arith.constant 0 : index
    %9 = vector.load %arg5[%c0_8, %c0_9] : memref<1x48xf32, #tpu.memory_space<vmem>>, vector<1x48xf32>
    %cst_10 = arith.constant dense<0.000000e+00> : vector<8x48xf32>
    %10 = tpu.matmul %7, %8, %cst_10 {dimension_numbers = #tpu.dot_dimension_numbers<[1], [0], [0], [1], [0, 0, 1, 1], [], []>} : vector<8x64xf32>, vector<64x48xf32>, vector<8x48xf32> -> vector<8x48xf32>
    %11 = vector.broadcast %9 : vector<1x48xf32> to vector<8x48xf32>
    %12 = arith.addf %10, %11 : vector<8x48xf32>
    %cst_11 = arith.constant 0.000000e+00 : f32
    %13 = vector.broadcast %cst_11 : f32 to vector<8x48xf32>
    %14 = arith.maximumf %12, %13 : vector<8x48xf32>
    %c0_12 = arith.constant 0 : index
    %c0_13 = arith.constant 0 : index
    %15 = vector.load %arg8[%c0_12, %c0_13] : memref<8x48xf32, #tpu.memory_space<vmem>>, vector<8x48xf32>
    tpu.vector_store %arg8[%c0_12, %c0_13], %14 {strides = array<i32>} : memref<8x48xf32, #tpu.memory_space<vmem>>, vector<8x48xf32>,
    %c0_14 = arith.constant 0 : index
    %c0_15 = arith.constant 0 : index
    %16 = vector.load %arg6[%c0_14, %c0_15] : memref<48x16xf32, #tpu.memory_space<vmem>>, vector<48x16xf32>
    %cst_16 = arith.constant dense<0.000000e+00> : vector<8x16xf32>
    %17 = tpu.matmul %14, %16, %cst_16 {dimension_numbers = #tpu.dot_dimension_numbers<[1], [0], [0], [1], [0, 0, 1, 1], [], []>} : vector<8x48xf32>, vector<48x16xf32>, vector<8x16xf32> -> vector<8x16xf32>
    %c0_17 = arith.constant 0 : index
    %c0_18 = arith.constant 0 : index
    %18 = vector.load %arg7[%c0_17, %c0_18] : memref<8x16xf32, #tpu.memory_space<vmem>>, vector<8x16xf32>
    tpu.vector_store %arg7[%c0_17, %c0_18], %17 {strides = array<i32>} : memref<8x16xf32, #tpu.memory_space<vmem>>, vector<8x16xf32>,
    return
  }
  func.func @transform_0(%arg0: i32) -> (i32, i32) {
    %c0_i32 = arith.constant 0 : i32
    %c0_i32_0 = arith.constant 0 : i32
    return %arg0, %c0_i32 : i32, i32
  }
  func.func @transform_1(%arg0: i32) -> (i32, i32) {
    %c0_i32 = arith.constant 0 : i32
    %c0_i32_0 = arith.constant 0 : i32
    %c0_i32_1 = arith.constant 0 : i32
    return %c0_i32, %c0_i32_0 : i32, i32
  }
  func.func @transform_2(%arg0: i32) -> (i32, i32) {
    %c0_i32 = arith.constant 0 : i32
    %c0_i32_0 = arith.constant 0 : i32
    %c0_i32_1 = arith.constant 0 : i32
    return %c0_i32, %c0_i32_0 : i32, i32
  }
  func.func @transform_3(%arg0: i32) -> (i32, i32) {
    %c0_i32 = arith.constant 0 : i32
    %c0_i32_0 = arith.constant 0 : i32
    %c0_i32_1 = arith.constant 0 : i32
    return %c0_i32, %c0_i32_0 : i32, i32
  }
  func.func @transform_4(%arg0: i32) -> (i32, i32) {
    %c0_i32 = arith.constant 0 : i32
    %c0_i32_0 = arith.constant 0 : i32
    %c0_i32_1 = arith.constant 0 : i32
    return %c0_i32, %c0_i32_0 : i32, i32
  }
  func.func @transform_5(%arg0: i32) -> (i32, i32) {
    %c0_i32 = arith.constant 0 : i32
    %c0_i32_0 = arith.constant 0 : i32
    %c0_i32_1 = arith.constant 0 : i32
    return %c0_i32, %c0_i32_0 : i32, i32
  }
  func.func @transform_6(%arg0: i32) -> (i32, i32) {
    %c0_i32 = arith.constant 0 : i32
    %c0_i32_0 = arith.constant 0 : i32
    return %arg0, %c0_i32 : i32, i32
  }
  func.func @transform_7(%arg0: i32) -> (i32, i32) {
    %c0_i32 = arith.constant 0 : i32
    %c0_i32_0 = arith.constant 0 : i32
    return %arg0, %c0_i32 : i32, i32
  }
}

</mosaic_0001>

<bundles_post_ra>
// kernel: tpu_custom_call.1
= control target key start
LH: loop header
LB: loop body
LE: loop exit
PB: predicated region body
PF: predicated region fallthrough
CT: control target
= control target key end

     0   :  { %s881_s0 = inlined_call_operand.vmem [shape: f32[16,32], index: 0, kind: input, shape index: {}]   ;;  %s882_s1 = inlined_call_operand.vmem [shape: f32[32,64], index: 1, kind: input, shape index: {}]   ;;  %s883_s2 = inlined_call_operand.vmem [shape: f32[1,64], index: 2, kind: input, shape index: {}]   ;;  %s884_s3 = inlined_call_operand.vmem [shape: f32[64,48], index: 3, kind: input, shape index: {}]   ;;  %s885_s4 = inlined_call_operand.vmem [shape: f32[1,48], index: 4, kind: input, shape index: {}]   ;;  %s886_s5 = inlined_call_operand.vmem [shape: f32[48,16], index: 5, kind: input, shape index: {}]   ;;  %s887_s6 = inlined_call_operand.hbm [shape: f32[16,16], index: 6, kind: output, shape index: {0}]   ;;  %s888_s7 = inlined_call_operand.hbm [shape: f32[16,48], index: 7, kind: output, shape index: {1}]  }
   0x1   :  { %890 = sst [smem:[#allocation8_spill]] %s881_s0 }
   0x2   :  { %891 = sst [smem:[#allocation9_spill]] %s882_s1 }
   0x3   :  { %13 = vsyncpa [#allocation3], 0 }
   0x4   :  { %15 = vsyncpa [#allocation3 + $0x1], 0 }
   0x5   :  { %16 = vsyncpa [#allocation5], 0 }
   0x6   :  { %18 = vsyncpa [#allocation5 + $0x1], 0  ;;  %s714_s24 = smov 0   ;;  %s716_s25 = smov 0  }
   0x7   :  { %s718_s26 = smov 0   ;;  %s720_s27 = smov 0  }
   0x8 LB: > { %s735_s28 = sadd.s32 4294967295, %s672_s27   ;;  %s516_s29 = sadd.s32 4294967294, %s672_s27   ;;  %s672_s27 = sphi %s720_s27, %s900_s27   ;;  %s668_s26 = sphi %s718_s26, %s899_s26   ;;  %s664_s25 = sphi %s716_s25, %s898_s25   ;;  %s660_s24 = sphi %s714_s24, %s897_s24  }
   0x9   : > { %s739_s30 = sadd.s32 1, %s672_s27   ;;  %s162_s8 = sadd.s32 1, %s668_s26 }
   0xa   : > { %s159_s9 = ssub.s32 %s672_s27, %s739_s30  ;;  %p172_p0 = scmp.ne.s32.totalorder %s668_s26, %s664_s25 }
   0xb   : > { %p160_p1 = scmp.eq.s32.totalorder %s159_s9, 0  ;;  %p173_p2 = scmp.eq.s32.totalorder %s735_s28, 1 }
   0xc   : > { %p178_p3 = scmp.ne.s32.totalorder %s664_s25, %s660_s24  ;;  %p179_p4 = scmp.eq.s32.totalorder %s516_s29, 1 }
   0xd   : > { %s750_s10 = scalar_select %p160_p1, %s668_s26, %s162_s8  }
   0xe   : > { %p752_p5 = por %p173_p2, %p172_p0  ;;  %p756_p6 = por %p179_p4, %p178_p3 }
   0xf   : > { %p519_p7 = scmp.ge.s32.totalorder %s672_s27, 1  ;;  %p245_p8 = scmp.lt.s32.totalorder %s672_s27, 3 }
  0x11   : > { %p246_p9 = pnand %p519_p7, %p245_p8 }
  0x12   : > { %s894_s1 = sld [smem:[#allocation9_spill]] (!%p246_p9)  ;;  %p281_p10 = scmp.lt.s32.totalorder (!%p246_p9), %s735_s28, 1 }
  0x13   : > { %249 = sbr.rel (%p246_p9) target bundleno = 427 (0x1ab), region = 44  ;;  %s895_s0 = sld [smem:[#allocation8_spill]] (!%p246_p9) }
  0x14   : > { %s528_s19 = sshll.u32 (!%p246_p9), %s735_s28, 3 }
  0x15   : > { %s419_s22 = scalar_lea.hbm (!%p246_p9), %s888_s7, %s528_s19 }
  0x16   : > { %s423_s29 = sshll.u32 (!%p246_p9), %s419_s22, 4  ;;  %s424_s29 = int_to_ptr.hbm [resolvable:$true] %s423_s29 }
  0x17   : > { %s592_s9 = sshra.s32 (!%p246_p9), %s424_s29, 4  ;;  %s593_s9 = int_to_ptr.hbm [resolvable:$true] %s592_s9 }
  0x18   : > { %v289_v0 = vld [vmem:[%s894_s1 + $0x18] sm:$0xff]  ;;  %v288_v1 = vld [vmem:[%s894_s1 + $0x10] sm:$0xff]  ;;  %v287_v4 = vld [vmem:[%s894_s1 + $0x8] sm:$0xff]  ;;  %s282_s23 = scalar_select %p281_p10, %s735_s28, 1  ;;  %vm294_vm0 = vcmask 261120   ;;  %vm331_vm1 = vcmask 523264  }
  0x19   : > { %310 = vmatpush.msra.mxu0 %v289_v0  ;;  %v326_v2 = vld [vmem:[%s884_s3 + $0x38] sm:$0xff]  ;;  %v325_v3 = vld [vmem:[%s884_s3 + $0x30] sm:$0xff]  ;;  %v324_v5 = vld [vmem:[%s884_s3 + $0x28] sm:$0xff]  ;;  %vm356_vm2 = vcmask 392192   ;;  %s594_s13 = scalar_lea.hbm %s593_s9, 8  ;;  %s598_s28 = scalar_lea.hbm %s888_s7, 16 }
  0x1a   : > { %343 = vmatpush.msra.mxu1 %v326_v2  ;;  %v286_v6 = vld [vmem:[%s894_s1] sm:$0xff]  ;;  %s522_s14 = sshll.u32 %s282_s23, 3  ;;  %v322_v9 = vld [vmem:[%s884_s3 + $0x18] sm:$0xff]  ;;  %v321_v10 = vld [vmem:[%s884_s3 + $0x10] sm:$0xff]  ;;  %p595_p11 = scmp.ne.s32.totalorder %s593_s9, %s594_s13 }
  0x1b   : > { %311 = vmatpush.msra.mxu0 %v288_v1  ;;  %s284_s17 = scalar_lea.vmem %s895_s0, %s522_s14  ;;  %v323_v7 = vld [vmem:[%s884_s3 + $0x20] sm:$0xff]  ;;  %v320_v11 = vld [vmem:[%s884_s3 + $0x8] sm:$0xff]  ;;  %v361_v15 = vld [vmem:[%s886_s5 + $0x18] sm:$0xff]  ;;  %s825_s14 = sand.u32 1, %s664_s25  }
  0x1c   : > { %344 = vmatpush.msra.mxu1 %v325_v3  ;;  %v285_v8 = vld [vmem:[%s284_s17] sm:$0xff]  ;;  %v363_v13 = vld [vmem:[%s886_s5 + $0x28] sm:$0xff]  ;;  %v360_v20 = vld [vmem:[%s886_s5 + $0x10] sm:$0xff]  ;;  %s889_s17 = sshll.u32 %s825_s14, 3  ;;  %s395_s8 = scalar_lea.sflag [#allocation5], %s825_s14 }
  0x1d   : > { %312 = vmatpush.msra.mxu0 %v287_v4  ;;  %v319_v12 = vld [vmem:[%s884_s3] sm:$0xff]  ;;  %377 = vmatpush.msra.mxu2 %v363_v13  ;;  %v359_v21 = vld [vmem:[%s886_s5 + $0x8] sm:$0xff]  ;;  %s280_s18 = scalar_lea.vmem [#allocation4], %s889_s17  ;;  %p596_p12 = pnand %p595_p11, %p752_p5 }
  0x1e   : > { %345 = vmatpush.msra.mxu1 %v324_v5  ;;  %v362_v14 = vld [vmem:[%s886_s5 + $0x20] sm:$0xff]  ;;  %s421_s23 = sshll.u32 %s280_s18, 4  ;;  %p599_p0 = scmp.lt.s32.totalorder %s593_s9, %s888_s7  ;;  %s422_s23 = int_to_ptr.vmem [resolvable:$true] %s421_s23 }
  0x1f   : > { %313 = vmatpush.msra.mxu0 %v286_v6  ;;  %378 = vmatpush.msra.mxu2 %v362_v14  ;;  %v576_v16 = vld [vmem:[%s883_s2] ss:$0 sm:$0xff]  ;;  %p597_p13 = pneg %p596_p12  ;;  %p600_p1 = scmp.lt.s32.totalorder %s598_s28, %s594_s13 }
  0x20   : > { %523 = vmatmul.msk.f32.vlgmr.msra.gmra.mxu0 %vm294_vm0, %v285_v8  ;;  %346 = vmatpush.msra.mxu1 %v323_v7  ;;  %v358_v22 = vld [vmem:[%s886_s5] sm:$0xff] }
  0x21   : > { %379 = vmatpush.msra.mxu2 %v361_v15  ;;  %v577_v23 = vld [vmem:[%s885_s4] ss:$0 sm:$0xff]  ;;  %p601_p2 = por %p600_p1, %p599_p0 }
  0x22   : > { %347 = vmatpush.msra.mxu1 %v322_v9 }
  0x23   : > { %380 = vmatpush.msra.mxu2 %v360_v20  ;;  %p602_p3 = pnand %p601_p2, %p597_p13 }
  0x24   : > { %348 = vmatpush.msra.mxu1 %v321_v10 }
  0x25   : > { %381 = vmatpush.msra.mxu2 %v359_v21 }
  0x26   : > { %349 = vmatpush.msra.mxu1 %v320_v11 }
  0x27   : > { %382 = vmatpush.msra.mxu2 %v358_v22 }
  0x28   : > { %350 = vmatpush.msra.mxu1 %v319_v12 }
  0x9d   : > { %v315_v17 = vpop.f32.mrf.mxu0 }
  0x9e   : > { %v316_v18 = vadd.f32 %v576_v16, %v315_v17 }
  0xa0   : > { %v318_v19 = vmax.f32 %v316_v18, 0.0 }
  0xa2   : > { %524 = vmatmul.msk.f32.vlgmr.msra.gmra.mxu1 %vm331_vm1, %v318_v19 }
 0x11f   : > { %v352_v24 = vpop.f32.mrf.mxu1 }
 0x120   : > { %v353_v25 = vadd.f32 %v577_v23, %v352_v24 }
 0x122   : > { %v355_v26 = vmax.f32 %v353_v25, 0.0 }
 0x124   : > { %525 = vmatmul.msk.f32.vlgmr.msra.gmra.mxu2 %vm356_vm2, %v355_v26  ;;  %357 = vst.msk [vmem:[%s280_s18] sm:$0xff] %vm356_vm2, %v355_v26 }
 0x125   : > { %605 = shalt.err (!%p602_p3)
}
 0x126   : > { %533 = dma.vmem_to_hbm [thread:$0]  (%p752_p5), %s422_s23, 128, %s424_s29, %s395_s8   ;;  %vm387_vm3 = vcmask 130048  }
 0x127   : > { %s405_s21 = scalar_lea.hbm %s887_s6, %s528_s19  ;;  %s896_s22 = sshll.u32 %s825_s14, 3 }
 0x128   : > { %s273_s15 = scalar_lea.vmem [#allocation2], %s896_s22  ;;  %s409_s1 = sshll.u32 %s405_s21, 4  ;;  %s410_s1 = int_to_ptr.hbm [resolvable:$true] %s409_s1 }
 0x129   : > { %s407_s16 = sshll.u32 %s273_s15, 4  ;;  %s390_s0 = scalar_lea.sflag [#allocation3], %s825_s14  ;;  %s408_s16 = int_to_ptr.vmem [resolvable:$true] %s407_s16 }
 0x12a   : > { %s620_s17 = sshra.s32 %s410_s1, 4  ;;  %s626_s19 = scalar_lea.hbm %s887_s6, 16  ;;  %s621_s17 = int_to_ptr.hbm [resolvable:$true] %s620_s17 }
 0x12b   : > { %s622_s9 = scalar_lea.hbm %s621_s17, 8  ;;  %p627_p9 = scmp.lt.s32.totalorder %s621_s17, %s887_s6 }
 0x12c   : > { %p623_p4 = scmp.ne.s32.totalorder %s621_s17, %s622_s9  ;;  %p628_p10 = scmp.lt.s32.totalorder %s626_s19, %s622_s9 }
 0x12e   : > { %p624_p7 = pnand %p623_p4, %p752_p5  ;;  %p629_p11 = por %p628_p10, %p627_p9 }
 0x130   : > { %p625_p8 = pneg %p624_p7 }
 0x132   : > { %p630_p12 = pnand %p629_p11, %p625_p8 }
 0x1a7   : > { %v384_v27 = vpop.f32.mrf.mxu2 }
 0x1a8   : > { %388 = vst.msk [vmem:[%s273_s15] sm:$0xff] %vm387_vm3, %v384_v27 }
 0x1a9   : > { %633 = shalt.err (!%p630_p12)
}
 0x1aa   : > { %532 = dma.vmem_to_hbm [thread:$0]  (%p752_p5), %s408_s16, 128, %s410_s1, %s390_s0  }
 0x1ab PF: > { %p543_p13 = scmp.ge.s32.totalorder %s672_s27, 2  ;;  %s435_s14 = sand.u32 1, %s660_s24  }
 0x1ac   : > { %s436_s28 = scalar_lea.sflag [#allocation3], %s435_s14 }
 0x1ad   : > { %p537_p0 = pnand %p543_p13, %p756_p6 }
 0x1af   : > { %p538_p1 = pneg %p537_p0 }
 0x1b1   : > { %651 = dma.done.wait (%p538_p1), %s436_s28, 128  }
 0x1b2   : > { %653 = vsyncadd (%p538_p1), %s436_s28, 4294967168  ;;  %s446_s18 = scalar_lea.sflag [#allocation5], %s435_s14 }
 0x1b3   : > { %655 = dma.done.wait (%p538_p1), %s446_s18, 128  }
 0x1b4   : > { %657 = vsyncadd (%p538_p1), %s446_s18, 4294967168  ;;  %p21_p5 = scmp.ge.s32.totalorder %s739_s30, 4   ;;  %s897_s24 = smov %s664_s25 }
 0x1b5   : > { %s898_s25 = smov %s668_s26  ;;  %s899_s26 = smov %s750_s10 }
 0x1b6   : > { %s900_s27 = smov %s739_s30  ;;  %23 = sbr.rel (!%p21_p5) target bundleno = 8 (0x8), region = 96 }
 0x1bb   :  { %452 = vsyncpa [#allocation3], 1 }
 0x1bc   :  { %454 = vsyncpa [#allocation3 + $0x1], 1 }
 0x1bd   :  { %455 = vsyncpa [#allocation5], 1 }
 0x1be   :  { %457 = vsyncpa [#allocation5 + $0x1], 1 }

</bundles_post_ra>
